<compile_context>
chip_gen: v7x
topology: tpu7x:2x2x1
jax: 0.10.0
libtpu: 0.0.40
codegen_flags: <defaults>
</compile_context>

<pallas_src>
import functools

import jax
import jax.numpy as jnp
from jax.experimental import pallas as pl
from jax.experimental.pallas import tpu as pltpu

_EPS = 1e-5


# ---------------------------------------------------------------------------
# In-kernel math helpers (operate on f32 (N, c, HW) blocks).
# ---------------------------------------------------------------------------
def _instance_norm(x, w, b, eps):
    # Per-(n, c) statistics over the HW (lane) axis.
    mu = jnp.mean(x, axis=-1, keepdims=True)
    xc = x - mu                                      # computed once, reused
    var = jnp.mean(xc * xc, axis=-1, keepdims=True)
    scale = jax.lax.rsqrt(var + eps) * w             # (N, c, 1); rsqrt -> EUP
    return xc * scale + b


def _batch_norm(x, w, b, eps):
    # Per-channel statistics over (N, HW) -- training-mode BatchNorm.
    mu = jnp.mean(x, axis=(0, 2), keepdims=True)
    xc = x - mu
    var = jnp.mean(xc * xc, axis=(0, 2), keepdims=True)
    scale = jax.lax.rsqrt(var + eps) * w             # (1, c, 1)
    return xc * scale + b


# ---------------------------------------------------------------------------
# Kernels
# ---------------------------------------------------------------------------
def _ibn_tiled_kernel(x_ref, w_ref, b_ref, o_ref, *, n_in_tiles, eps):
    """One grid step = one channel tile (entirely in the IN or the BN half)."""
    t = pl.program_id(0)
    x = x_ref[...].astype(jnp.float32)               # (N, ct, HW)
    w = w_ref[...].astype(jnp.float32)               # (ct, 1) -> bcast (1, ct, 1)
    b = b_ref[...].astype(jnp.float32)

    @pl.when(t < n_in_tiles)
    def _():                                         # InstanceNorm half
        o_ref[...] = _instance_norm(x, w, b, eps).astype(o_ref.dtype)

    @pl.when(t >= n_in_tiles)
    def _():                                         # BatchNorm half
        o_ref[...] = _batch_norm(x, w, b, eps).astype(o_ref.dtype)


def _ibn_fused_kernel(x_ref, w_ref, b_ref, o_ref, *, half, eps):
    """Fallback: whole tensor in one block (half < 8 or odd channel split)."""
    x = x_ref[...].astype(jnp.float32)               # (N, C, HW)
    w = w_ref[...].astype(jnp.float32)               # (C, 1)
    b = b_ref[...].astype(jnp.float32)
    o_ref[:, :half, :] = _instance_norm(
        x[:, :half, :], w[:half], b[:half], eps).astype(o_ref.dtype)
    o_ref[:, half:, :] = _batch_norm(
        x[:, half:, :], w[half:], b[half:], eps).astype(o_ref.dtype)


# ---------------------------------------------------------------------------
# Wrapper
# ---------------------------------------------------------------------------
def _pick_channel_tile(n, c1, c2, hw, itemsize,
                       max_block_bytes=4 * 1024 * 1024):
    """Largest multiple-of-8 channel tile that divides both halves and keeps
    one (N, ct, HW) block under the VMEM budget (double-buffered in + out
    stays well below the v7x 64 MiB physical VMEM)."""
    if c1 != c2 or c1 % 8 != 0:
        return None
    divisors = [ct for ct in range(8, c1 + 1, 8) if c1 % ct == 0]
    within = [ct for ct in divisors if n * ct * hw * itemsize <= max_block_bytes]
    return max(within) if within else min(divisors)


def ibn_forward(x, in_weight, in_bias, bn_weight, bn_bias, half):
    """IBN forward. x: (N, C, H, W) (NCHW, like PyTorch).

    InstanceNorm2d(affine=True) on channels [0, half), training-mode
    BatchNorm2d on channels [half, C).
    """
    N, C, H, W = x.shape
    hw = H * W
    c1 = half
    c2 = C - half

    x3 = x.reshape(N, C, hw)                         # contiguous -> free
    # Tiny (C elements) concat of the affine params, laid out (C, 1) so a
    # (ct, 1) block satisfies the (8, 128) tiling rule.
    w = jnp.concatenate([in_weight, bn_weight]).reshape(C, 1).astype(jnp.float32)
    b = jnp.concatenate([in_bias, bn_bias]).reshape(C, 1).astype(jnp.float32)

    itemsize = jnp.dtype(x.dtype).itemsize
    ct = _pick_channel_tile(N, c1, c2, hw, itemsize)

    n_elems = N * C * hw
    cost = pl.CostEstimate(
        flops=8 * n_elems,                           # sub, sq, fma, reductions
        transcendentals=N * c1 + c2,                 # one rsqrt per stat group
        bytes_accessed=2 * n_elems * itemsize + 2 * C * 4,
    )
    cparams = pltpu.CompilerParams(
        dimension_semantics=("parallel",) if ct is not None else ("arbitrary",),
        vmem_limit_bytes=48 * 1024 * 1024,
    )

    if ct is not None:
        grid = (C // ct,)
        kernel = functools.partial(
            _ibn_tiled_kernel, n_in_tiles=c1 // ct, eps=_EPS)
        in_specs = [
            pl.BlockSpec((N, ct, hw), lambda t: (0, t, 0)),  # channel-offset
            pl.BlockSpec((ct, 1), lambda t: (t, 0)),
            pl.BlockSpec((ct, 1), lambda t: (t, 0)),
        ]
        out_specs = pl.BlockSpec((N, ct, hw), lambda t: (0, t, 0))
    else:
        grid = (1,)
        kernel = functools.partial(_ibn_fused_kernel, half=c1, eps=_EPS)
        in_specs = [
            pl.BlockSpec((N, C, hw), lambda t: (0, 0, 0)),
            pl.BlockSpec((C, 1), lambda t: (0, 0)),
            pl.BlockSpec((C, 1), lambda t: (0, 0)),
        ]
        out_specs = pl.BlockSpec((N, C, hw), lambda t: (0, 0, 0))

    out = pl.pallas_call(
        kernel,
        out_shape=jax.ShapeDtypeStruct((N, C, hw), x.dtype),
        grid=grid,
        in_specs=in_specs,
        out_specs=out_specs,
        compiler_params=cparams,
        cost_estimate=cost,
    )(x3, w, b)

    return out.reshape(N, C, H, W)


# ---------------------------------------------------------------------------
# Pure-JAX reference (mirrors PyTorch IBN forward semantics, train-mode BN).
# ---------------------------------------------------------------------------
def _reference(x, in_weight, in_bias, bn_weight, bn_bias, half):
    x = x.astype(jnp.float32)
    x1 = x[:, :half]
    x2 = x[:, half:]
    mu = jnp.mean(x1, axis=(2, 3), keepdims=True)
    var = jnp.var(x1, axis=(2, 3), keepdims=True)
    o1 = (x1 - mu) / jnp.sqrt(var + _EPS)
    o1 = o1 * in_weight[None, :, None, None] + in_bias[None, :, None, None]
    mu_b = jnp.mean(x2, axis=(0, 2, 3), keepdims=True)
    var_b = jnp.var(x2, axis=(0, 2, 3), keepdims=True)
    o2 = (x2 - mu_b) / jnp.sqrt(var_b + _EPS)
    o2 = o2 * bn_weight[None, :, None, None] + bn_bias[None, :, None, None]
    return jnp.concatenate([o1, o2], axis=1)


if __name__ == "__main__":
    def run_case(key, N, planes, H, W):
        half = planes // 2
        c2 = planes - half
        x = jax.random.normal(key, (N, planes, H, W), dtype=jnp.float32)
        # Deterministic, non-trivial affine parameters.
        in_weight = 1.0 + 0.1 * jnp.arange(half, dtype=jnp.float32)
        in_bias = 0.05 * jnp.arange(half, dtype=jnp.float32)
        bn_weight = 1.0 - 0.05 * jnp.arange(c2, dtype=jnp.float32)
        bn_bias = -0.02 * jnp.arange(c2, dtype=jnp.float32)

        out = ibn_forward(x, in_weight, in_bias, bn_weight, bn_bias, half)
        out = jax.block_until_ready(out)
        ref = _reference(x, in_weight, in_bias, bn_weight, bn_bias, half)
        assert out.shape == (N, planes, H, W)
        assert jnp.allclose(out, ref, atol=1e-4, rtol=1e-4), (N, planes, H, W)

    k0, k1 = jax.random.split(jax.random.PRNGKey(0))
    # Tiled path: planes=32 -> half=16, channel tile 16, parallel grid,
    # channel-offset BlockSpecs, H*W=256 lane-dense.
    run_case(k0, 2, 32, 16, 16)
    # Fallback fused path: planes=4 -> half=2 (< 8), single-block kernel.
    run_case(k1, 2, 4, 16, 16)

    print("KERNEL_OK")
</pallas_src>

<mosaic_0001>
module attributes {stable_mosaic.version = 11 : i64} {
  func.func @_ibn_tiled_kernel(%arg0: i32, %arg1: memref<2x16x256xf32, #tpu.memory_space<vmem>>, %arg2: memref<16x1xf32, #tpu.memory_space<vmem>>, %arg3: memref<16x1xf32, #tpu.memory_space<vmem>>, %arg4: memref<2x16x256xf32, #tpu.memory_space<vmem>>) attributes {dimension_semantics = [#tpu.dimension_semantics<parallel>], iteration_bounds = array<i64: 2>, scalar_prefetch = 0 : i64, scratch_operands = 0 : i64, tpu.core_type = #tpu.core_type<tc>, window_params = [{transform_indices = @transform_0, window_bounds = array<i64: 2, 16, 256>}, {transform_indices = @transform_1, window_bounds = array<i64: 16, 1>}, {transform_indices = @transform_2, window_bounds = array<i64: 16, 1>}, {transform_indices = @transform_3, window_bounds = array<i64: 2, 16, 256>}]} {
    %c0 = arith.constant 0 : index
    %c0_0 = arith.constant 0 : index
    %c0_1 = arith.constant 0 : index
    %0 = vector.load %arg1[%c0, %c0_0, %c0_1] : memref<2x16x256xf32, #tpu.memory_space<vmem>>, vector<2x16x256xf32>
    %c0_2 = arith.constant 0 : index
    %c0_3 = arith.constant 0 : index
    %1 = vector.load %arg2[%c0_2, %c0_3] : memref<16x1xf32, #tpu.memory_space<vmem>>, vector<16x1xf32>
    %c0_4 = arith.constant 0 : index
    %c0_5 = arith.constant 0 : index
    %2 = vector.load %arg3[%c0_4, %c0_5] : memref<16x1xf32, #tpu.memory_space<vmem>>, vector<16x1xf32>
    %c1_i32 = arith.constant 1 : i32
    %3 = arith.cmpi slt, %arg0, %c1_i32 : i32
    %4 = arith.extui %3 : i1 to i32
    %c0_i32 = arith.constant 0 : i32
    %5 = arith.cmpi ne, %4, %c0_i32 : i32
    scf.if %5 {
      %cst = arith.constant dense<0.000000e+00> : vector<2x16xf32>
      %9 = vector.multi_reduction <add>, %0, %cst [2] : vector<2x16x256xf32> to vector<2x16xf32>
      %10 = vector.shape_cast %9 : vector<2x16xf32> to vector<2x16x1xf32>
      %cst_8 = arith.constant 2.560000e+02 : f32
      %11 = vector.broadcast %cst_8 : f32 to vector<2x16x1xf32>
      %12 = arith.divf %10, %11 : vector<2x16x1xf32>
      %13 = vector.broadcast %12 : vector<2x16x1xf32> to vector<2x16x256xf32>
      %14 = arith.subf %0, %13 : vector<2x16x256xf32>
      %15 = arith.mulf %14, %14 : vector<2x16x256xf32>
      %cst_9 = arith.constant dense<0.000000e+00> : vector<2x16xf32>
      %16 = vector.multi_reduction <add>, %15, %cst_9 [2] : vector<2x16x256xf32> to vector<2x16xf32>
      %17 = vector.shape_cast %16 : vector<2x16xf32> to vector<2x16x1xf32>
      %cst_10 = arith.constant 2.560000e+02 : f32
      %18 = vector.broadcast %cst_10 : f32 to vector<2x16x1xf32>
      %19 = arith.divf %17, %18 : vector<2x16x1xf32>
      %cst_11 = arith.constant 9.99999974E-6 : f32
      %20 = vector.broadcast %cst_11 : f32 to vector<2x16x1xf32>
      %21 = arith.addf %19, %20 : vector<2x16x1xf32>
      %22 = math.rsqrt %21 : vector<2x16x1xf32>
      %23 = vector.shape_cast %1 : vector<16x1xf32> to vector<1x16x1xf32>
      %24 = vector.broadcast %23 : vector<1x16x1xf32> to vector<2x16x1xf32>
      %25 = arith.mulf %22, %24 : vector<2x16x1xf32>
      %26 = vector.broadcast %25 : vector<2x16x1xf32> to vector<2x16x256xf32>
      %27 = arith.mulf %14, %26 : vector<2x16x256xf32>
      %28 = vector.shape_cast %2 : vector<16x1xf32> to vector<1x16x1xf32>
      %29 = vector.broadcast %28 : vector<1x16x1xf32> to vector<2x16x256xf32>
      %30 = arith.addf %27, %29 : vector<2x16x256xf32>
      %c0_12 = arith.constant 0 : index
      %c0_13 = arith.constant 0 : index
      %c0_14 = arith.constant 0 : index
      %31 = vector.load %arg4[%c0_12, %c0_13, %c0_14] : memref<2x16x256xf32, #tpu.memory_space<vmem>>, vector<2x16x256xf32>
      tpu.vector_store %arg4[%c0_12, %c0_13, %c0_14], %30 {strides = array<i32>} : memref<2x16x256xf32, #tpu.memory_space<vmem>>, vector<2x16x256xf32>,
    } else {
    }
    %c1_i32_6 = arith.constant 1 : i32
    %6 = arith.cmpi sge, %arg0, %c1_i32_6 : i32
    %7 = arith.extui %6 : i1 to i32
    %c0_i32_7 = arith.constant 0 : i32
    %8 = arith.cmpi ne, %7, %c0_i32_7 : i32
    scf.if %8 {
      %cst = arith.constant dense<0.000000e+00> : vector<16xf32>
      %9 = vector.multi_reduction <add>, %0, %cst [0, 2] : vector<2x16x256xf32> to vector<16xf32>
      %10 = vector.shape_cast %9 : vector<16xf32> to vector<1x16x1xf32>
      %cst_8 = arith.constant 5.120000e+02 : f32
      %11 = vector.broadcast %cst_8 : f32 to vector<1x16x1xf32>
      %12 = arith.divf %10, %11 : vector<1x16x1xf32>
      %13 = vector.broadcast %12 : vector<1x16x1xf32> to vector<2x16x256xf32>
      %14 = arith.subf %0, %13 : vector<2x16x256xf32>
      %15 = arith.mulf %14, %14 : vector<2x16x256xf32>
      %cst_9 = arith.constant dense<0.000000e+00> : vector<16xf32>
      %16 = vector.multi_reduction <add>, %15, %cst_9 [0, 2] : vector<2x16x256xf32> to vector<16xf32>
      %17 = vector.shape_cast %16 : vector<16xf32> to vector<1x16x1xf32>
      %cst_10 = arith.constant 5.120000e+02 : f32
      %18 = vector.broadcast %cst_10 : f32 to vector<1x16x1xf32>
      %19 = arith.divf %17, %18 : vector<1x16x1xf32>
      %cst_11 = arith.constant 9.99999974E-6 : f32
      %20 = vector.broadcast %cst_11 : f32 to vector<1x16x1xf32>
      %21 = arith.addf %19, %20 : vector<1x16x1xf32>
      %22 = math.rsqrt %21 : vector<1x16x1xf32>
      %23 = vector.shape_cast %1 : vector<16x1xf32> to vector<1x16x1xf32>
      %24 = arith.mulf %22, %23 : vector<1x16x1xf32>
      %25 = vector.broadcast %24 : vector<1x16x1xf32> to vector<2x16x256xf32>
      %26 = arith.mulf %14, %25 : vector<2x16x256xf32>
      %27 = vector.shape_cast %2 : vector<16x1xf32> to vector<1x16x1xf32>
      %28 = vector.broadcast %27 : vector<1x16x1xf32> to vector<2x16x256xf32>
      %29 = arith.addf %26, %28 : vector<2x16x256xf32>
      %c0_12 = arith.constant 0 : index
      %c0_13 = arith.constant 0 : index
      %c0_14 = arith.constant 0 : index
      %30 = vector.load %arg4[%c0_12, %c0_13, %c0_14] : memref<2x16x256xf32, #tpu.memory_space<vmem>>, vector<2x16x256xf32>
      tpu.vector_store %arg4[%c0_12, %c0_13, %c0_14], %29 {strides = array<i32>} : memref<2x16x256xf32, #tpu.memory_space<vmem>>, vector<2x16x256xf32>,
    } else {
    }
    return
  }
  func.func @transform_0(%arg0: i32) -> (i32, i32, i32) {
    %c0_i32 = arith.constant 0 : i32
    %c0_i32_0 = arith.constant 0 : i32
    %c0_i32_1 = arith.constant 0 : i32
    return %c0_i32, %arg0, %c0_i32_0 : i32, i32, i32
  }
  func.func @transform_1(%arg0: i32) -> (i32, i32) {
    %c0_i32 = arith.constant 0 : i32
    %c0_i32_0 = arith.constant 0 : i32
    return %arg0, %c0_i32 : i32, i32
  }
  func.func @transform_2(%arg0: i32) -> (i32, i32) {
    %c0_i32 = arith.constant 0 : i32
    %c0_i32_0 = arith.constant 0 : i32
    return %arg0, %c0_i32 : i32, i32
  }
  func.func @transform_3(%arg0: i32) -> (i32, i32, i32) {
    %c0_i32 = arith.constant 0 : i32
    %c0_i32_0 = arith.constant 0 : i32
    %c0_i32_1 = arith.constant 0 : i32
    return %c0_i32, %arg0, %c0_i32_0 : i32, i32, i32
  }
}

</mosaic_0001>

<bundles_post_ra>
// kernel: tpu_custom_call.1
= control target key start
LH: loop header
LB: loop body
LE: loop exit
PB: predicated region body
PF: predicated region fallthrough
CT: control target
= control target key end

     0   :  { %8 = vsyncpa [#allocation3], 0  ;;  %s1078_s0 = inlined_call_operand.hbm [shape: f32[2,32,256], index: 0, kind: input, shape index: {}]   ;;  %s1079_s1 = inlined_call_operand.vmem [shape: f32[32,1], index: 1, kind: input, shape index: {}]   ;;  %s1080_s2 = inlined_call_operand.vmem [shape: f32[32,1], index: 2, kind: input, shape index: {}]   ;;  %s1081_s3 = inlined_call_operand.hbm [shape: f32[2,32,256], index: 3, kind: output, shape index: {}]  }
   0x1   :  { %10 = vsyncpa [#allocation3 + $0x1], 0 }
   0x2   :  { %11 = vsyncpa [#allocation4], 0 }
   0x3   :  { %13 = vsyncpa [#allocation4 + $0x1], 0  ;;  %s816_s12 = smov 0   ;;  %s818_s13 = smov 0  }
   0x4   :  { %s820_s14 = smov 0   ;;  %s822_s15 = smov 0  }
   0x5 LB: > { %s837_s16 = sadd.s32 4294967295, %s779_s15   ;;  %s628_s17 = sadd.s32 4294967294, %s779_s15   ;;  %s779_s15 = sphi %s822_s15, %s1089_s15   ;;  %s775_s14 = sphi %s820_s14, %s1088_s14   ;;  %s771_s13 = sphi %s818_s13, %s1087_s13   ;;  %s767_s12 = sphi %s816_s12, %s1086_s12  }
   0x6   : > { %s841_s18 = sadd.s32 1, %s779_s15   ;;  %s26_s19 = sadd.s32 1, %s775_s14 }
   0x7   : > { %s23_s20 = ssub.s32 %s779_s15, %s841_s18  ;;  %p33_p0 = scmp.ne.s32.totalorder %s775_s14, %s771_s13 }
   0x8   : > { %p24_p1 = scmp.eq.s32.totalorder %s23_s20, 0  ;;  %p34_p2 = scmp.eq.s32.totalorder %s779_s15, 0 }
   0x9   : > { %p39_p3 = scmp.ne.s32.totalorder %s771_s13, %s767_s12  ;;  %p40_p4 = scmp.eq.s32.totalorder %s837_s16, 0 }
   0xa   : > { %s853_s21 = scalar_select %p24_p1, %s775_s14, %s26_s19  }
   0xb   : > { %p855_p5 = por %p34_p2, %p33_p0  ;;  %p859_p6 = por %p40_p4, %p39_p3 }
   0xc   : > { %p115_p7 = scmp.eq.s32.totalorder %s837_s16, 1  ;;  %p121_p8 = scmp.eq.s32.totalorder %s628_s17, 1 }
   0xd   : > { %p630_p11 = scmp.ge.s32.totalorder %s779_s15, 2 }
   0xe   : > { %p864_p9 = por %p115_p7, %p33_p0  ;;  %p868_p10 = por %p121_p8, %p39_p3 }
   0xf   : > { %137 = sbr.rel (%p630_p11) target bundleno = 35 (0x23), region = 16 }
  0x16   : > { %s141_s26 = sand.u32 1, %s775_s14   ;;  %s653_s27 = sshll.u32 %s779_s15, 9 }
  0x17   : > { %s631_s28 = sshll.u32 %s141_s26, 6  ;;  %s152_s4 = scalar_lea.hbm %s1078_s0, %s653_s27 }
  0x18   : > { %s656_s5 = scalar_select %p855_p5, [#allocation0], [#allocation10] }
  0x19   : > { %s145_s6 = scalar_lea.vmem [#allocation2], %s631_s28  ;;  %s781_s9 = smov 1024  }
  0x1a   : > { %s165_s7 = sshll.u32 %s145_s6, 4  ;;  %s157_s8 = sld [smem:[%s656_s5]]   ;;  %s166_s7 = int_to_ptr.vmem [resolvable:$true] %s165_s7 }
  0x1b   : > { %657 = sst [smem:[#allocation7]] (%p855_p5), %s781_s9  ;;  %s782_s10 = smov 512  }
  0x1c   : > { %658 = sst [smem:[#allocation7 + $0x1]] (%p855_p5), %s782_s10  ;;  %s783_s11 = smov 2  }
  0x1d   : > { %659 = sst [smem:[#allocation7 + $0x2]] (%p855_p5), %s783_s11  ;;  %s784_s17 = smov 256  }
  0x1e   : > { %660 = sst [smem:[#allocation7 + $0x3]] (%p855_p5), %s784_s17  ;;  %s785_s20 = smov 16  }
  0x1f   : > { %661 = sst [smem:[#allocation7 + $0x4]] (%p855_p5), %s784_s17  ;;  %s142_s28 = scalar_lea.sflag [#allocation3], %s141_s26 }
  0x20   : > { %s635_s19 = sshll.u32 %s157_s8, 26  ;;  %662 = sst [smem:[#allocation7 + $0x5]] (%p855_p5), %s785_s20 }
  0x21   : > { %s636_s27 = sadd.s32 134217728, %s635_s19  ;;  %s786_s29 = smov [#allocation6]  }
  0x22   : > { %663 = dma.general (%p855_p5), %s152_s4, 1024, %s166_s7, %s142_s28, %s786_s29, [#allocation7], %s636_s27, 0  }
  0x23 PF: > { %p637_p12 = scmp.ge.s32.totalorder %s779_s15, 1  ;;  %p204_p13 = scmp.lt.s32.totalorder %s779_s15, 3 }
  0x25   : > { %p205_p0 = pnand %p637_p12, %p204_p13 }
  0x26   : > { %s899_s30 = sand.u32 (!%p205_p0), 1, %s771_s13  }
  0x27   : > { %208 = sbr.rel (%p205_p0) target bundleno = 979 (0x3d3), region = 32  ;;  %s638_s5 = sshll.u32 (!%p205_p0), %s899_s30, 6 }
  0x28   : > { %s211_s6 = scalar_lea.sflag (!%p205_p0), [#allocation3], %s899_s30  ;;  %s214_s8 = scalar_lea.vmem (!%p205_p0), [#allocation2], %s638_s5 }
  0x2e   : > { %758 = dma.done.wait (%p859_p6), %s211_s6, 1024  }
  0x2f   : > { %760 = vsyncadd (%p859_p6), %s211_s6, 4294966272  ;;  %s640_s22 = sshll.u32 %s837_s16, 1  ;;  %v914_v0 = vld [vmem:[%s214_s8] sm:$0xff]  ;;  %v916_v1 = vld [vmem:[%s214_s8 + $0x8] sm:$0xff]  ;;  %s938_s23 = scalar_lea.vmem [#allocation5], %s638_s5 }
  0x30   : > { %p249_p1 = scmp.lt.s32.totalorder %s640_s22, 3  ;;  %v918_v2 = vld [vmem:[%s214_s8 + $0x10] sm:$0xff]  ;;  %v920_v3 = vld [vmem:[%s214_s8 + $0x18] sm:$0xff]  ;;  %v922_v4 = vld [vmem:[%s214_s8 + $0x20] sm:$0xff]  ;;  %p644_p2 = scmp.ge.s32.totalorder %s837_s16, 1 }
  0x31   : > { %v924_v5 = vld [vmem:[%s214_s8 + $0x28] sm:$0xff]  ;;  %v926_v6 = vld [vmem:[%s214_s8 + $0x30] sm:$0xff]  ;;  %v928_v7 = vld [vmem:[%s214_s8 + $0x38] sm:$0xff]  ;;  %v277_v12 = vadd.f32 (!%p644_p2), %v916_v1, %v914_v0  ;;  %v280_v14 = vadd.f32 (!%p644_p2), %v920_v3, %v918_v2  ;;  %v787_v44 = vmov (!%p644_p2), 0  }
  0x32   : > { %s1091_s22 = smov (!%p249_p1, %s640_s22), 3  ;;  %276 = sbr.rel (%p644_p2) target bundleno = 509 (0x1fd), region = 40 }
  0x33   : > { %s641_s26 = sshll.u32 %s1091_s22, 3  ;;  %v283_v13 = vadd.f32 (!%p644_p2), %v924_v5, %v922_v4  ;;  %278 = vadd.xlane.f32.xlu0 (!%p644_p2), %v277_v12  ;;  %v286_v15 = vadd.f32 (!%p644_p2), %v928_v7, %v926_v6  ;;  %726 = vset.pattern.permute.xlu1 (!%p644_p2), %v787_v44 }
  0x34   : > { %s252_s9 = scalar_lea.vmem %s1079_s1, %s641_s26  ;;  %s258_s17 = scalar_lea.vmem %s1080_s2, %s641_s26  ;;  %725 = vset.pattern.permute.xlu0 (!%p644_p2), %v787_v44 }
  0x35   : > { %v930_v8 = vld [vmem:[%s252_s9] sm:$0xff]  ;;  %v932_v9 = vld [vmem:[%s252_s9 + $0x8] sm:$0xff]  ;;  %284 = vadd.xlane.f32.xlu1 (!%p644_p2), %v283_v13 }
  0x36   : > { %v934_v10 = vld [vmem:[%s258_s17] sm:$0xff]  ;;  %v936_v11 = vld [vmem:[%s258_s17 + $0x8] sm:$0xff] }
  0x37   : > { %281 = vadd.xlane.f32.xlu0 (!%p644_p2), %v280_v14 }
  0x39   : > { %287 = vadd.xlane.f32.xlu1 %v286_v15 }
  0xc0   : > { %v279_v16 = vpop.xlane.xlu0 %278 }
  0xc1   : > { %v290_v18 = vmul.f32 0.00390625, %v279_v16 }
  0xc2   : > { %v285_v17 = vpop.xlane.xlu1 %284 }
  0xc3   : > { %v292_v19 = vmul.f32 0.00390625, %v285_v17  ;;  %v950_v20 = vsub.f32 %v914_v0, %v290_v18  ;;  %v953_v21 = vsub.f32 %v916_v1, %v290_v18 }
  0xc4   : > { %v282_v24 = vpop.xlane.xlu0 %281 }
  0xc5   : > { %v956_v22 = vsub.f32 %v922_v4, %v292_v19  ;;  %v959_v23 = vsub.f32 %v924_v5, %v292_v19  ;;  %v291_v26 = vmul.f32 0.00390625, %v282_v24  ;;  %v302_v27 = vmul.f32 %v950_v20, %v950_v20 }
  0xc6   : > { %v288_v25 = vpop.xlane.xlu1 %287  ;;  %v303_v28 = vmul.f32 %v953_v21, %v953_v21 }
  0xc7   : > { %v293_v29 = vmul.f32 0.00390625, %v288_v25  ;;  %v306_v30 = vmul.f32 %v956_v22, %v956_v22  ;;  %v307_v31 = vmul.f32 %v959_v23, %v959_v23  ;;  %v970_v32 = vsub.f32 %v918_v2, %v291_v26 }
  0xc8   : > { %v973_v33 = vsub.f32 %v920_v3, %v291_v26  ;;  %v310_v34 = vadd.f32 %v303_v28, %v302_v27 }
  0xc9   : > { %v976_v35 = vsub.f32 %v926_v6, %v293_v29  ;;  %v979_v36 = vsub.f32 %v928_v7, %v293_v29  ;;  %v304_v37 = vmul.f32 %v970_v32, %v970_v32  ;;  %v316_v39 = vadd.f32 %v307_v31, %v306_v30 }
  0xca   : > { %311 = vadd.xlane.f32.xlu0 %v310_v34  ;;  %v305_v38 = vmul.f32 %v973_v33, %v973_v33 }
  0xcb   : > { %v308_v40 = vmul.f32 %v976_v35, %v976_v35  ;;  %v309_v41 = vmul.f32 %v979_v36, %v979_v36 }
  0xcc   : > { %v313_v42 = vadd.f32 %v305_v38, %v304_v37 }
  0xcd   : > { %v319_v43 = vadd.f32 %v309_v41, %v308_v40 }
  0xce   : > { %314 = vadd.xlane.f32.xlu1 %v313_v42  ;;  %317 = vadd.xlane.f32.xlu0 %v316_v39 }
  0xd2   : > { %320 = vadd.xlane.f32.xlu1 %v319_v43 }
  0xe3   : > { %368 = vperm.xlu1 %726, %v934_v10  }
 0x157   : > { %v312_v45 = vpop.xlane.xlu0 %311 }
 0x158   : > { %v322_v46 = vmul.f32 0.00390625, %v312_v45 }
 0x15a   : > { %v326_v47 = vadd.f32 1e-05, %v322_v46 }
 0x15b   : > { %v315_v48 = vpop.xlane.xlu1 %314  ;;  %v318_v49 = vpop.xlane.xlu0 %317 }
 0x15c   : > { %727 = vrsqrt.f32 %v326_v47  ;;  %v323_v50 = vmul.f32 0.00390625, %v315_v48  ;;  %v324_v51 = vmul.f32 0.00390625, %v318_v49 }
 0x15e   : > { %v327_v52 = vadd.f32 1e-05, %v323_v50  ;;  %v328_v53 = vadd.f32 1e-05, %v324_v51 }
 0x15f   : > { %v321_v54 = vpop.xlane.xlu1 %320 }
 0x160   : > { %729 = vrsqrt.f32 %v327_v52  ;;  %v325_v55 = vmul.f32 0.00390625, %v321_v54 }
 0x161   : > { %731 = vrsqrt.f32 %v328_v53 }
 0x162   : > { %v329_v56 = vadd.f32 1e-05, %v325_v55 }
 0x163   : > { %v369_v13 = vpop.permute.xlu1 %368 }
 0x164   : > { %733 = vrsqrt.f32 %v329_v56 }
 0x166   : > { %v728_v57 = vpop.eup %727 }
 0x167   : > { %v334_v58 = vmul.f32 %v728_v57, %v930_v8 }
 0x169   : > { %340 = vperm.xlu0 %725, %v334_v58  }
 0x16a   : > { %v730_v59 = vpop.eup %729 }
 0x16b   : > { %v732_v60 = vpop.eup %731  ;;  %v335_v61 = vmul.f32 %v730_v59, %v932_v9 }
 0x16c   : > { %v336_v62 = vmul.f32 %v732_v60, %v930_v8 }
 0x16d   : > { %345 = vperm.xlu1 %726, %v335_v61  }
 0x16e   : > { %v734_v63 = vpop.eup %733 }
 0x16f   : > { %v337_v12 = vmul.f32 %v734_v63, %v932_v9 }
 0x171   : > { %350 = vperm.xlu1 %726, %v336_v62  }
 0x175   : > { %355 = vperm.xlu1 %726, %v337_v12  }
 0x179   : > { %373 = vperm.xlu1 %726, %v936_v11  }
 0x1e8   : > { %v341_v14 = vpop.permute.xlu0 %340 }
 0x1e9   : > { %v358_v15 = vmul.f32 %v341_v14, %v950_v20  ;;  %v359_v16 = vmul.f32 %v341_v14, %v953_v21 }
 0x1eb   : > { %v376_v17 = vadd.f32 %v369_v13, %v358_v15  ;;  %v377_v18 = vadd.f32 %v369_v13, %v359_v16 }
 0x1ec   : > { %v346_v19 = vpop.permute.xlu1 %345 }
 0x1ed   : > { %384 = vst [vmem:[%s938_s23] sm:$0xff] %v376_v17  ;;  %385 = vst [vmem:[%s938_s23 + $0x8] sm:$0xff] %v377_v18  ;;  %v360_v20 = vmul.f32 %v346_v19, %v970_v32  ;;  %v361_v21 = vmul.f32 %v346_v19, %v973_v33 }
 0x1f0   : > { %v351_v24 = vpop.permute.xlu1 %350 }
 0x1f1   : > { %v362_v25 = vmul.f32 %v351_v24, %v956_v22  ;;  %v363_v26 = vmul.f32 %v351_v24, %v959_v23 }
 0x1f3   : > { %v380_v27 = vadd.f32 %v369_v13, %v362_v25  ;;  %v381_v28 = vadd.f32 %v369_v13, %v363_v26 }
 0x1f4   : > { %v356_v29 = vpop.permute.xlu1 %355 }
 0x1f5   : > { %388 = vst [vmem:[%s938_s23 + $0x20] sm:$0xff] %v380_v27  ;;  %389 = vst [vmem:[%s938_s23 + $0x28] sm:$0xff] %v381_v28  ;;  %v364_v30 = vmul.f32 %v356_v29, %v976_v35  ;;  %v365_v31 = vmul.f32 %v356_v29, %v979_v36 }
 0x1f8   : > { %v374_v22 = vpop.permute.xlu1 %373 }
 0x1f9   : > { %v378_v34 = vadd.f32 %v374_v22, %v360_v20  ;;  %v379_v37 = vadd.f32 %v374_v22, %v361_v21  ;;  %v382_v23 = vadd.f32 %v374_v22, %v364_v30  ;;  %v383_v38 = vadd.f32 %v374_v22, %v365_v31 }
 0x1fb   : > { %386 = vst [vmem:[%s938_s23 + $0x10] sm:$0xff] %v378_v34  ;;  %387 = vst [vmem:[%s938_s23 + $0x18] sm:$0xff] %v379_v37 }
 0x1fc   : > { %390 = vst [vmem:[%s938_s23 + $0x30] sm:$0xff] %v382_v23  ;;  %391 = vst [vmem:[%s938_s23 + $0x38] sm:$0xff] %v383_v38 }
 0x1fd PF: > { %p645_p3 = scmp.lt.s32.totalorder %s837_s16, 1 }
 0x1fe   : > { %v396_v32 = vadd.f32 (!%p645_p3), %v916_v1, %v914_v0  ;;  %v401_v33 = vadd.f32 (!%p645_p3), %v920_v3, %v918_v2 }
 0x1ff   : > { %395 = sbr.rel (%p645_p3) target bundleno = 969 (0x3c9), region = 44 }
 0x200   : > { %v397_v35 = vadd.f32 (!%p645_p3), %v396_v32, %v922_v4  ;;  %v402_v36 = vadd.f32 (!%p645_p3), %v401_v33, %v926_v6 }
 0x202   : > { %v398_v39 = vadd.f32 (!%p645_p3), %v397_v35, %v924_v5  ;;  %v403_v40 = vadd.f32 (!%p645_p3), %v402_v36, %v928_v7 }
 0x204   : > { %399 = vadd.xlane.f32.xlu0 (!%p645_p3), %v398_v39 }
 0x208   : > { %404 = vadd.xlane.f32.xlu0 %v403_v40 }
 0x291   : > { %v400_v41 = vpop.xlane.xlu0 %399 }
 0x292   : > { %v407_v42 = vmul.f32 0.001953125, %v400_v41 }
 0x294   : > { %v409_v43 = vsub.f32 %v914_v0, %v407_v42  ;;  %v410_v44 = vsub.f32 %v916_v1, %v407_v42  ;;  %v413_v45 = vsub.f32 %v922_v4, %v407_v42  ;;  %v414_v47 = vsub.f32 %v924_v5, %v407_v42 }
 0x295   : > { %v405_v46 = vpop.xlane.xlu0 %404 }
 0x296   : > { %v408_v48 = vmul.f32 0.001953125, %v405_v46  ;;  %v417_v49 = vmul.f32 %v409_v43, %v409_v43  ;;  %v418_v50 = vmul.f32 %v410_v44, %v410_v44  ;;  %v421_v51 = vmul.f32 %v413_v45, %v413_v45 }
 0x297   : > { %v422_v56 = vmul.f32 %v414_v47, %v414_v47 }
 0x298   : > { %v411_v52 = vsub.f32 %v918_v2, %v408_v48  ;;  %v412_v53 = vsub.f32 %v920_v3, %v408_v48  ;;  %v425_v54 = vadd.f32 %v418_v50, %v417_v49  ;;  %v415_v55 = vsub.f32 %v926_v6, %v408_v48 }
 0x299   : > { %v416_v1 = vsub.f32 %v928_v7, %v408_v48  ;;  %v788_v2 = vmov 0  }
 0x29a   : > { %v426_v0 = vadd.f32 %v425_v54, %v421_v51  ;;  %v419_v57 = vmul.f32 %v411_v52, %v411_v52  ;;  %v420_v4 = vmul.f32 %v412_v53, %v412_v53  ;;  %v423_v59 = vmul.f32 %v415_v55, %v415_v55  ;;  %736 = vset.pattern.permute.xlu1 %v788_v2 }
 0x29b   : > { %v424_v60 = vmul.f32 %v416_v1, %v416_v1  ;;  %735 = vset.pattern.permute.xlu0 %v788_v2 }
 0x29c   : > { %v427_v58 = vadd.f32 %v426_v0, %v422_v56  ;;  %v430_v5 = vadd.f32 %v420_v4, %v419_v57 }
 0x29e   : > { %428 = vadd.xlane.f32.xlu1 %v427_v58  ;;  %v431_v61 = vadd.f32 %v430_v5, %v423_v59 }
 0x2a0   : > { %v432_v62 = vadd.f32 %v431_v61, %v424_v60 }
 0x2a2   : > { %433 = vadd.xlane.f32.xlu1 %v432_v62 }
 0x2b3   : > { %463 = vperm.xlu1 %736, %v934_v10  }
 0x32b   : > { %v429_v3 = vpop.xlane.xlu1 %428 }
 0x32c   : > { %v435_v6 = vmul.f32 0.001953125, %v429_v3 }
 0x32e   : > { %v437_v63 = vadd.f32 1e-05, %v435_v6 }
 0x32f   : > { %v434_v12 = vpop.xlane.xlu1 %433 }
 0x330   : > { %737 = vrsqrt.f32 %v437_v63  ;;  %v436_v7 = vmul.f32 0.001953125, %v434_v12 }
 0x332   : > { %v438_v13 = vadd.f32 1e-05, %v436_v7 }
 0x333   : > { %v464_v10 = vpop.permute.xlu1 %463 }
 0x334   : > { %739 = vrsqrt.f32 %v438_v13 }
 0x33a   : > { %v738_v14 = vpop.eup %737 }
 0x33b   : > { %v441_v15 = vmul.f32 %v738_v14, %v930_v8 }
 0x33d   : > { %445 = vperm.xlu0 %735, %v441_v15  }
 0x33e   : > { %v740_v16 = vpop.eup %739 }
 0x33f   : > { %v442_v17 = vmul.f32 %v740_v16, %v932_v9 }
 0x341   : > { %450 = vperm.xlu1 %736, %v442_v17  }
 0x345   : > { %468 = vperm.xlu1 %736, %v936_v11  }
 0x3bc   : > { %v446_v18 = vpop.permute.xlu0 %445 }
 0x3bd   : > { %v453_v19 = vmul.f32 %v446_v18, %v409_v43  ;;  %v454_v24 = vmul.f32 %v446_v18, %v410_v44  ;;  %v457_v25 = vmul.f32 %v446_v18, %v413_v45  ;;  %v458_v26 = vmul.f32 %v446_v18, %v414_v47 }
 0x3bf   : > { %v471_v27 = vadd.f32 %v464_v10, %v453_v19  ;;  %v472_v28 = vadd.f32 %v464_v10, %v454_v24  ;;  %v475_v8 = vadd.f32 %v464_v10, %v457_v25  ;;  %v476_v29 = vadd.f32 %v464_v10, %v458_v26 }
 0x3c0   : > { %v451_v20 = vpop.permute.xlu1 %450 }
 0x3c1   : > { %479 = vst [vmem:[%s938_s23] sm:$0xff] %v471_v27  ;;  %480 = vst [vmem:[%s938_s23 + $0x8] sm:$0xff] %v472_v28  ;;  %v455_v9 = vmul.f32 %v451_v20, %v411_v52  ;;  %v456_v11 = vmul.f32 %v451_v20, %v412_v53  ;;  %v459_v21 = vmul.f32 %v451_v20, %v415_v55 }
 0x3c2   : > { %483 = vst [vmem:[%s938_s23 + $0x20] sm:$0xff] %v475_v8  ;;  %484 = vst [vmem:[%s938_s23 + $0x28] sm:$0xff] %v476_v29  ;;  %v460_v30 = vmul.f32 %v451_v20, %v416_v1 }
 0x3c4   : > { %v469_v31 = vpop.permute.xlu1 %468 }
 0x3c5   : > { %v473_v22 = vadd.f32 %v469_v31, %v455_v9  ;;  %v474_v34 = vadd.f32 %v469_v31, %v456_v11  ;;  %v477_v37 = vadd.f32 %v469_v31, %v459_v21  ;;  %v478_v23 = vadd.f32 %v469_v31, %v460_v30 }
 0x3c7   : > { %481 = vst [vmem:[%s938_s23 + $0x10] sm:$0xff] %v473_v22  ;;  %482 = vst [vmem:[%s938_s23 + $0x18] sm:$0xff] %v474_v34 }
 0x3c8   : > { %485 = vst [vmem:[%s938_s23 + $0x30] sm:$0xff] %v477_v37  ;;  %486 = vst [vmem:[%s938_s23 + $0x38] sm:$0xff] %v478_v23 }
 0x3c9 PF: > { %s488_s19 = scalar_lea.sflag [#allocation4], %s899_s30 }
 0x3ca   : > { %s655_s20 = sshll.u32 %s837_s16, 9  ;;  %s518_s27 = sshll.u32 %s938_s23, 4  ;;  %s519_s27 = int_to_ptr.vmem [resolvable:$true] %s518_s27 }
 0x3cb   : > { %s501_s5 = scalar_lea.hbm %s1081_s3, %s655_s20  ;;  %s789_s6 = smov 512  }
 0x3cc   : > { %665 = sst [smem:[#allocation9]] (%p864_p9), %s789_s6  ;;  %s790_s30 = smov 1024  }
 0x3cd   : > { %666 = sst [smem:[#allocation9 + $0x1]] (%p864_p9), %s790_s30  ;;  %s791_s8 = smov 2  }
 0x3ce   : > { %667 = sst [smem:[#allocation9 + $0x2]] (%p864_p9), %s791_s8  ;;  %s792_s22 = smov 256  }
 0x3cf   : > { %668 = sst [smem:[#allocation9 + $0x3]] (%p864_p9), %s792_s22  ;;  %s793_s16 = smov 16  }
 0x3d0   : > { %669 = sst [smem:[#allocation9 + $0x4]] (%p864_p9), %s792_s22  ;;  %s794_s26 = smov [#allocation8]  }
 0x3d1   : > { %670 = sst [smem:[#allocation9 + $0x5]] (%p864_p9), %s793_s16  ;;  %s795_s4 = smov 0  }
 0x3d2   : > { %671 = dma.general (%p864_p9), %s519_s27, 1024, %s501_s5, %s488_s19, %s794_s26, [#allocation9], %s795_s4, 0  }
 0x3d3 PF: > { %s546_s7 = sand.u32 1, %s767_s12   ;;  %p674_p4 = pnand %p630_p11, %p868_p10 }
 0x3d4   : > { %s547_s9 = scalar_lea.sflag [#allocation4], %s546_s7 }
 0x3d5   : > { %762 = dma.done.wait (!%p674_p4), %s547_s9, 1024  }
 0x3d6   : > { %764 = vsyncadd (!%p674_p4), %s547_s9, 4294966272  ;;  %p16_p5 = scmp.ge.s32.totalorder %s841_s18, 4   ;;  %s1086_s12 = smov %s771_s13 }
 0x3d7   : > { %s1087_s13 = smov %s775_s14  ;;  %s1088_s14 = smov %s853_s21 }
 0x3d8   : > { %s1089_s15 = smov %s841_s18  ;;  %18 = sbr.rel (!%p16_p5) target bundleno = 5 (0x5), region = 101 }
 0x3df   :  { %552 = vsyncpa [#allocation3], 1 }
 0x3e0   :  { %554 = vsyncpa [#allocation3 + $0x1], 1 }
 0x3e1   :  { %555 = vsyncpa [#allocation4], 1 }
 0x3e2   :  { %557 = vsyncpa [#allocation4 + $0x1], 1 }

</bundles_post_ra>
